<compile_context>
chip_gen: v5e
topology: v5e:2x2
jax: 0.10.0
libtpu: 0.0.40
codegen_flags: <defaults>
</compile_context>

<pallas_src>
import functools

import jax
import jax.numpy as jnp
import numpy as np
from jax.experimental import pallas as pl
from jax.experimental.pallas import tpu as pltpu

_EPS = 1e-8  # torch.cosine_similarity default eps


def _cos_sim_kernel(p_ref, x_ref, o_ref):
    # p_ref : (K, C)  unit-norm prototypes (pre-normalized in the wrapper)
    # x_ref : (C, T)  one (batch, spatial-tile) slab of feat in native NCHW layout
    # o_ref : (K, T)  output tile (lane-dense along T)
    # MXU: contract over C directly in the stored layout — no transposes anywhere.
    dots = jnp.dot(p_ref[...], x_ref[...], preferred_element_type=jnp.float32)

    x = x_ref[...].astype(jnp.float32)
    x_norm = jnp.sqrt(jnp.sum(x * x, axis=0, keepdims=True))        # (1, T), f32
    inv = pl.reciprocal(jnp.maximum(x_norm, _EPS), approx=True)     # EUP slot: ~free
    o_ref[...] = jnp.maximum(dots * inv, 0.0).astype(o_ref.dtype)


@functools.lru_cache(maxsize=None)
def _vmem_limit_bytes():
    """Explicit scoped-VMEM request: <= half of physical VMEM, capped at 48 MiB.

    v5e/v6e (128 MiB physical) -> 48 MiB (default on v5e is only ~16 MiB);
    v7x (64 MiB physical per TC) -> 32 MiB.
    """
    try:
        phys = pltpu.get_tpu_info().vmem_capacity_bytes
    except Exception:  # pragma: no cover - conservative fallback (v7x per-TC size)
        phys = 64 << 20
    return int(min(phys // 2, 48 << 20))


def _choose_spatial_tile(thw, c, k, in_bytes, out_bytes, budget_bytes):
    """Pick the spatial (lane) tile T.  Never requires a wrapper-side pad."""
    # In-flight bytes per spatial column: double-buffered (C,T) input + (K,T) output.
    per_col = 2 * c * in_bytes + 2 * k * out_bytes
    cap = max(128, min(8192, budget_bytes // max(per_col, 1)))
    if thw <= cap:
        return thw                      # full spatial extent: single tile, no 128 rule
    # Largest multiple of 128 <= cap that divides thw exactly (no ragged tail).
    t = (cap // 128) * 128
    while t >= 128:
        if thw % t == 0:
            return t
        t -= 128
    # No exact divisor: use the largest multiple of 128 <= cap; the grid uses
    # pl.cdiv and Pallas masks writes of the ragged last block (no wrapper pad).
    return (cap // 128) * 128


@functools.partial(jax.jit, static_argnames=("class_numbers",))
def feat_prototype_distance(feat, objective_vectors, class_numbers=21):
    """feat: (N, C, H, W); objective_vectors: (class_numbers, C) or (K, C, 1, 1).

    Returns (N, class_numbers, H, W) — matches the PyTorch module (relu(cos_sim)).
    """
    N, C, H, W = feat.shape
    K = class_numbers
    thw = H * W

    # Pre-normalize prototypes once in f32 (hoists ||p|| out of the kernel and
    # removes the per-tile (K,T) divide): cos = <p_hat, x> / max(||x||, eps).
    p = objective_vectors.reshape(K, C).astype(jnp.float32)
    p_norm = jnp.sqrt(jnp.sum(p * p, axis=-1, keepdims=True))
    p_hat = (p / jnp.maximum(p_norm, _EPS)).astype(feat.dtype)

    out_dtype = jnp.result_type(feat.dtype, objective_vectors.dtype)
    x = feat.reshape(N, C, thw)                      # free reshape (native NCHW)

    in_bytes = jnp.dtype(feat.dtype).itemsize
    out_bytes = jnp.dtype(out_dtype).itemsize
    vmem_limit = _vmem_limit_bytes()
    T = _choose_spatial_tile(thw, C, K, in_bytes, out_bytes, (vmem_limit * 3) // 4)
    n_tiles = pl.cdiv(thw, T)

    cost = pl.CostEstimate(
        flops=2 * N * thw * C * K,
        transcendentals=N * thw,  # one rsqrt/reciprocal per spatial column
        bytes_accessed=in_bytes * (N * C * thw + K * C) + out_bytes * N * K * thw,
    )

    out = pl.pallas_call(
        _cos_sim_kernel,
        out_shape=jax.ShapeDtypeStruct((N, K, thw), out_dtype),
        grid_spec=pltpu.PrefetchScalarGridSpec(
            num_scalar_prefetch=0,
            # Long spatial axis first so v7x's two TensorCores shard it even when
            # N is 1-2; both axes are independent -> "parallel".
            grid=(n_tiles, N),
            in_specs=[
                pl.BlockSpec((K, C), lambda j, n: (0, 0)),           # prototypes (resident)
                pl.BlockSpec((None, C, T), lambda j, n: (n, 0, j)),  # feat slab (N squeezed)
            ],
            out_specs=pl.BlockSpec((None, K, T), lambda j, n: (n, 0, j)),
        ),
        compiler_params=pltpu.CompilerParams(
            dimension_semantics=("parallel", "parallel"),
            vmem_limit_bytes=vmem_limit,
        ),
        cost_estimate=cost,
    )(p_hat, x)

    return out.reshape(N, K, H, W)                   # already NCHW-ordered, no copies


def _reference(feat, objective_vectors, class_numbers=21):
    # Pure-JAX reference mirroring torch.cosine_similarity + relu semantics.
    N, C, H, W = feat.shape
    K = class_numbers
    p = objective_vectors.reshape(K, C).astype(jnp.float32)
    f = feat.astype(jnp.float32)
    dot = jnp.einsum("nchw,kc->nkhw", f, p)
    fn = jnp.sqrt(jnp.sum(f * f, axis=1))[:, None]                  # (N, 1, H, W)
    vn = jnp.sqrt(jnp.sum(p * p, axis=1))[None, :, None, None]      # (1, K, 1, 1)
    cos = dot / (jnp.maximum(fn, _EPS) * jnp.maximum(vn, _EPS))
    return jnp.maximum(cos, 0.0)


if __name__ == "__main__":
    key = jax.random.PRNGKey(0)
    k_feat, k_proto = jax.random.split(key)

    N, C, H, W = 2, 4, 16, 16
    CLASS_NUMBERS = 21  # fixed by the module's .view(21, C, 1, 1)

    feat = jax.random.normal(k_feat, (N, C, H, W), dtype=jnp.float32)
    objective_vectors = jax.random.normal(
        k_proto, (CLASS_NUMBERS, C), dtype=jnp.float32
    )

    out = feat_prototype_distance(feat, objective_vectors, class_numbers=CLASS_NUMBERS)
    out = jax.block_until_ready(out)
    assert out.shape == (N, CLASS_NUMBERS, H, W)

    ref = _reference(feat, objective_vectors, class_numbers=CLASS_NUMBERS)
    # Tolerance loosened vs 1e-5 because the kernel uses the approx EUP reciprocal
    # (relu(cos) values are bounded in [0, 1], so 5e-3 is ample).
    np.testing.assert_allclose(np.asarray(out), np.asarray(ref), rtol=5e-3, atol=5e-3)

    print("KERNEL_OK")
</pallas_src>

<mosaic_0001>
module attributes {stable_mosaic.version = 11 : i64} {
  func.func @_cos_sim_kernel(%arg0: i32, %arg1: i32, %arg2: memref<21x4xf32, #tpu.memory_space<vmem>>, %arg3: memref<1x4x256xf32, #tpu.memory_space<vmem>>, %arg4: memref<1x21x256xf32, #tpu.memory_space<vmem>>) attributes {dimension_semantics = [#tpu.dimension_semantics<parallel>, #tpu.dimension_semantics<parallel>], iteration_bounds = array<i64: 1, 2>, scalar_prefetch = 0 : i64, scratch_operands = 0 : i64, tpu.core_type = #tpu.core_type<tc>, window_params = [{pipeline_mode = #tpu.pipeline_mode<synchronous>, transform_indices = @transform_0, window_bounds = array<i64: 21, 4>}, {transform_indices = @transform_1, window_bounds = array<i64: 1, 4, 256>}, {transform_indices = @transform_2, window_bounds = array<i64: 1, 21, 256>}]} {
    %c0 = arith.constant 0 : index
    %c0_0 = arith.constant 0 : index
    %0 = vector.load %arg2[%c0, %c0_0] : memref<21x4xf32, #tpu.memory_space<vmem>>, vector<21x4xf32>
    %c0_1 = arith.constant 0 : index
    %c0_2 = arith.constant 0 : index
    %c0_3 = arith.constant 0 : index
    %1 = vector.load %arg3[%c0_1, %c0_2, %c0_3] : memref<1x4x256xf32, #tpu.memory_space<vmem>>, vector<1x4x256xf32>
    %2 = vector.shape_cast %1 : vector<1x4x256xf32> to vector<4x256xf32>
    %cst = arith.constant dense<0.000000e+00> : vector<21x256xf32>
    %3 = tpu.matmul %0, %2, %cst {dimension_numbers = #tpu.dot_dimension_numbers<[1], [0], [0], [1], [0, 0, 1, 1], [], []>} : vector<21x4xf32>, vector<4x256xf32>, vector<21x256xf32> -> vector<21x256xf32>
    %c0_4 = arith.constant 0 : index
    %c0_5 = arith.constant 0 : index
    %c0_6 = arith.constant 0 : index
    %4 = vector.load %arg3[%c0_4, %c0_5, %c0_6] : memref<1x4x256xf32, #tpu.memory_space<vmem>>, vector<1x4x256xf32>
    %5 = vector.shape_cast %4 : vector<1x4x256xf32> to vector<4x256xf32>
    %6 = arith.mulf %5, %5 : vector<4x256xf32>
    %cst_7 = arith.constant dense<0.000000e+00> : vector<256xf32>
    %7 = vector.multi_reduction <add>, %6, %cst_7 [0] : vector<4x256xf32> to vector<256xf32>
    %8 = vector.shape_cast %7 : vector<256xf32> to vector<1x256xf32>
    %9 = math.sqrt %8 : vector<1x256xf32>
    %cst_8 = arith.constant 9.99999993E-9 : f32
    %10 = vector.broadcast %cst_8 : f32 to vector<1x256xf32>
    %11 = arith.maximumf %9, %10 : vector<1x256xf32>
    %12 = tpu.reciprocal %11 {approx = true} : vector<1x256xf32> -> vector<1x256xf32>
    %13 = vector.broadcast %12 : vector<1x256xf32> to vector<21x256xf32>
    %14 = arith.mulf %3, %13 : vector<21x256xf32>
    %cst_9 = arith.constant 0.000000e+00 : f32
    %15 = vector.broadcast %cst_9 : f32 to vector<21x256xf32>
    %16 = arith.maximumf %14, %15 : vector<21x256xf32>
    %c0_10 = arith.constant 0 : index
    %c0_11 = arith.constant 0 : index
    %c0_12 = arith.constant 0 : index
    %17 = vector.load %arg4[%c0_10, %c0_11, %c0_12] : memref<1x21x256xf32, #tpu.memory_space<vmem>>, vector<1x21x256xf32>
    %18 = vector.shape_cast %17 : vector<1x21x256xf32> to vector<21x256xf32>
    %19 = vector.shape_cast %16 : vector<21x256xf32> to vector<1x21x256xf32>
    tpu.vector_store %arg4[%c0_10, %c0_11, %c0_12], %19 {strides = array<i32>} : memref<1x21x256xf32, #tpu.memory_space<vmem>>, vector<1x21x256xf32>,
    return
  }
  func.func @transform_0(%arg0: i32, %arg1: i32) -> (i32, i32) {
    %c0_i32 = arith.constant 0 : i32
    %c0_i32_0 = arith.constant 0 : i32
    %c0_i32_1 = arith.constant 0 : i32
    return %c0_i32, %c0_i32_0 : i32, i32
  }
  func.func @transform_1(%arg0: i32, %arg1: i32) -> (i32, i32, i32) {
    %c0_i32 = arith.constant 0 : i32
    %c0_i32_0 = arith.constant 0 : i32
    return %arg1, %c0_i32, %arg0 : i32, i32, i32
  }
  func.func @transform_2(%arg0: i32, %arg1: i32) -> (i32, i32, i32) {
    %c0_i32 = arith.constant 0 : i32
    %c0_i32_0 = arith.constant 0 : i32
    return %arg1, %c0_i32, %arg0 : i32, i32, i32
  }
}

</mosaic_0001>

<bundles_post_ra>
// kernel: feat_prototype_distance.1
= control target key start
LH: loop header
LB: loop body
LE: loop exit
PB: predicated region body
PF: predicated region fallthrough
CT: control target
= control target key end

     0   :  { %s505_s9 = smov 0   ;;  %s507_s10 = smov 0   ;;  %s557_s0 = inlined_call_operand.vmem [shape: f32[21,4], index: 0, kind: input, shape index: {}]   ;;  %s558_s1 = inlined_call_operand.vmem [shape: f32[2,4,256], index: 1, kind: input, shape index: {}]   ;;  %s559_s2 = inlined_call_operand.vmem [shape: f32[2,21,256], index: 2, kind: output, shape index: {}]  }
   0x1   :  { %s509_s11 = smov 0  }
   0x2 LB: > { %s21_s12 = sadd.s32 1, %s484_s10  ;;  %p416_p0 = scmp.ge.s32.totalorder %s488_s11, 1  ;;  %s488_s11 = sphi %s509_s11, %s12_s11   ;;  %s484_s10 = sphi %s507_s10, %s561_s10   ;;  %s480_s9 = sphi %s505_s9, %s560_s9  }
   0x3   : > { %p22_p1 = scmp.ge.s32.totalorder %s21_s12, 2  ;;  %p133_p2 = scmp.lt.s32.totalorder %s488_s11, 3 }
   0x5   : > { %s563_s12 = smov (%p22_p1, %s21_s12), 0  ;;  %p134_p3 = pnand %p416_p0, %p133_p2 }
   0x6   : > { %p164_p4 = scmp.lt.s32.totalorder (!%p134_p3), %s480_s9, 1 }
   0x7   : > { %137 = sbr.rel (%p134_p3) target bundleno = 171 (0xab), region = 28 }
   0xc   : > { %s565_s9 = smov (!%p164_p4, %s480_s9), 1  ;;  %vm201_vm0 = vcmask 1043456   ;;  %v184_v2 = vld [vmem:[%s557_s0 + $0x8] sm:$0xff]  ;;  %vm191_vm1 = vcmask 31744   ;;  %v183_v5 = vld [vmem:[%s557_s0] sm:$0xff] }
   0xd   : > { %s430_s13 = sshll.u32 %s565_s9, 3  ;;  %v185_v6 = vld [vmem:[%s557_s0 + $0x10] sm:$0x1f]  ;;  %s433_s23 = smul.u32 48, %s565_s9 }
   0xe   : > { %s171_s16 = scalar_lea.vmem %s558_s1, %s430_s13 }
   0xf   : > { %v186_v0 = vld [vmem:[%s171_s16] sm:$0xff]  ;;  %s181_s26 = scalar_lea.vmem %s559_s2, %s433_s23 }
  0x10   : > { %188 = vst [vmem:[#allocation1] ss:$2 sm:$0xff] %v186_v0  ;;  %v258_v1 = vmul.f32 %v186_v0, %v186_v0 }
  0x17   : > { %v189_v3 = vld.sshfl [vmem:[#allocation1] sm:$0xff pattern:$0x75316420]  ;;  %v190_v4 = vld.sshfl [vmem:[#allocation1 + $0x8] sm:$0xff pattern:$0x75316420] }
  0x18   : > { %431 = vmatpush.msk.msra.mxu2 %vm201_vm0, %v189_v3  ;;  %432 = vmatpush.msk.msra.mxu3 %vm201_vm0, %v190_v4  ;;  %260 = vst [vmem:[#allocation1] ss:$2 sm:$0xff] %v258_v1 }
  0x19   : > { %422 = vmatmul.msk.f32.vlgmr.msra.gmra.mxu2 %vm191_vm1, %v184_v2  ;;  %426 = vmatmul.msk.f32.vlgmr.msra.gmra.mxu3 %vm191_vm1, %v184_v2 }
  0x1a   : > { %420 = vmatpush.msk.msra.mxu0 %vm201_vm0, %v189_v3  ;;  %424 = vmatpush.msk.msra.mxu1 %vm201_vm0, %v190_v4 }
  0x1b   : > { %421 = vmatmul.msk.f32.vlgmr.msra.gmra.mxu0 %vm191_vm1, %v183_v5  ;;  %425 = vmatmul.msk.f32.vlgmr.msra.gmra.mxu1 %vm191_vm1, %v183_v5 }
  0x1f   : > { %v261_v7 = vld.sshfl [vmem:[#allocation1] sm:$0xff pattern:$0x75316420]  ;;  %v262_v8 = vld.sshfl [vmem:[#allocation1 + $0x8] sm:$0xff pattern:$0x75316420] }
  0x20   : > { %v265_v9 = vsel %vm201_vm0, %v261_v7, 0.0  ;;  %v272_v10 = vsel %vm201_vm0, %v262_v8, 0.0 }
  0x21   : > { %423 = vmatmul.msk.f32.gmra.mxu2 %vm191_vm1, %v185_v6  ;;  %427 = vmatmul.msk.f32.gmra.mxu3 %vm191_vm1, %v185_v6  ;;  %v266_v11 = vrot.slane %v265_v9, 4  ;;  %v273_v12 = vrot.slane %v272_v10, 4 }
  0x23   : > { %v267_v13 = vadd.f32 %v266_v11, %v265_v9  ;;  %v274_v14 = vadd.f32 %v273_v12, %v272_v10 }
  0x25   : > { %v268_v15 = vrot.slane %v267_v13, 2  ;;  %v275_v16 = vrot.slane %v274_v14, 2 }
  0x27   : > { %v269_v17 = vadd.f32 %v268_v15, %v267_v13  ;;  %v276_v18 = vadd.f32 %v275_v16, %v274_v14 }
  0x29   : > { %v270_v19 = vrot.slane %v269_v17, 1  ;;  %v277_v20 = vrot.slane %v276_v18, 1 }
  0x2b   : > { %v271_v21 = vadd.f32 %v270_v19, %v269_v17  ;;  %v278_v22 = vadd.f32 %v277_v20, %v276_v18 }
  0x2d   : > { %458 = vrsqrt.f32 %v271_v21  ;;  %vm286_vm2 = vcmp.eq.f32.partialorder %v271_v21, inf  ;;  %vm298_vm3 = vcmp.eq.f32.partialorder %v278_v22, inf  ;;  %v289_v37 = vand.u32 2147483648, %v271_v21 }
  0x2e   : > { %460 = vrsqrt.f32 %v278_v22  ;;  %vm288_vm4 = vcmp.eq.f32.partialorder %v271_v21, 0.0  ;;  %v301_v39 = vand.u32 2147483648, %v278_v22  ;;  %vm300_vm5 = vcmp.eq.f32.partialorder %v278_v22, 0.0 }
  0x33   : > { %v459_v23 = vpop.eup %458 }
  0x34   : > { %v461_v24 = vpop.eup %460  ;;  %v280_v25 = vmul.f32 %v459_v23, %v271_v21 }
  0x35   : > { %v292_v26 = vmul.f32 %v461_v24, %v278_v22 }
  0x36   : > { %v281_v27 = vmul.f32 %v459_v23, %v280_v25 }
  0x37   : > { %v293_v28 = vmul.f32 %v461_v24, %v292_v26 }
  0x38   : > { %v282_v29 = vmul.f32 0.5, %v281_v27 }
  0x39   : > { %v294_v30 = vmul.f32 0.5, %v293_v28 }
  0x3a   : > { %v283_v31 = vsub.f32 1.5, %v282_v29 }
  0x3b   : > { %v295_v32 = vsub.f32 1.5, %v294_v30 }
  0x3c   : > { %v284_v33 = vmul.f32 %v459_v23, %v283_v31 }
  0x3d   : > { %v296_v34 = vmul.f32 %v461_v24, %v295_v32 }
  0x3e   : > { %v285_v35 = vmul.f32 %v284_v33, %v271_v21 }
  0x3f   : > { %v297_v36 = vmul.f32 %v296_v34, %v278_v22 }
  0x40   : > { %v287_v38 = vsel %vm286_vm2, %v271_v21, %v285_v35 }
  0x41   : > { %v299_v40 = vsel %vm298_vm3, %v278_v22, %v297_v36  ;;  %v290_v41 = vsel %vm288_vm4, %v289_v37, %v287_v38 }
  0x42   : > { %v302_v42 = vsel %vm300_vm5, %v301_v39, %v299_v40  ;;  %v303_v43 = vmax.f32 %v290_v41, 1e-08 }
  0x43   : > { %v304_v44 = vmax.f32 %v302_v42, 1e-08 }
  0x44   : > { %462 = vrcp.f32 %v303_v43 }
  0x45   : > { %464 = vrcp.f32 %v304_v44 }
  0x4a   : > { %v463_v45 = vpop.eup %462 }
  0x4b   : > { %v465_v46 = vpop.eup %464 }
  0x98   : > { %v223_v47 = vpop.f32.mrf.mxu0  ;;  %v249_v48 = vpop.f32.mrf.mxu1 }
  0x99   : > { %v307_v49 = vmul.f32 %v463_v45, %v223_v47  ;;  %v308_v50 = vmul.f32 %v465_v46, %v249_v48 }
  0x9b   : > { %v313_v51 = vmax.f32 %v307_v49, 0.0  ;;  %v314_v52 = vmax.f32 %v308_v50, 0.0 }
  0x9c   : > { %v226_v53 = vpop.f32.mrf.mxu2  ;;  %v252_v54 = vpop.f32.mrf.mxu3 }
  0x9d   : > { %v309_v55 = vmul.f32 %v463_v45, %v226_v53  ;;  %v310_v56 = vmul.f32 %v465_v46, %v252_v54  ;;  %319 = vst [vmem:[%s181_s26] sm:$0xff] %v313_v51 }
  0x9e   : > { %320 = vst [vmem:[%s181_s26 + $0x8] sm:$0xff] %v314_v52 }
  0x9f   : > { %v315_v57 = vmax.f32 %v309_v55, 0.0  ;;  %v316_v58 = vmax.f32 %v310_v56, 0.0 }
  0xa1   : > { %321 = vst [vmem:[%s181_s26 + $0x10] sm:$0xff] %v315_v57 }
  0xa2   : > { %322 = vst [vmem:[%s181_s26 + $0x18] sm:$0xff] %v316_v58 }
  0xa4   : > { %v229_v59 = vpop.f32.mrf.mxu2  ;;  %v255_v60 = vpop.f32.mrf.mxu3 }
  0xa5   : > { %v311_v61 = vmul.f32 %v463_v45, %v229_v59  ;;  %v312_v62 = vmul.f32 %v465_v46, %v255_v60 }
  0xa7   : > { %v317_v63 = vmax.f32 %v311_v61, 0.0  ;;  %v318_v0 = vmax.f32 %v312_v62, 0.0 }
  0xa9   : > { %323 = vst [vmem:[%s181_s26 + $0x20] sm:$0x1f] %v317_v63 }
  0xaa   : > { %324 = vst [vmem:[%s181_s26 + $0x28] sm:$0x1f] %v318_v0 }
  0xab PF: > { %s12_s11 = sadd.s32 1, %s488_s11   ;;  %s560_s9 = smov %s484_s10 }
  0xac   : > { %p9_p5 = scmp.ge.s32.totalorder %s12_s11, 4   ;;  %s561_s10 = smov %s563_s12 }
  0xae   :  { %11 = sbr.rel (!%p9_p5) target bundleno = 2 (0x2), region = 58 }

</bundles_post_ra>
